<compile_context>
chip_gen: v7x
topology: tpu7x:2x2x1
jax: 0.10.0
libtpu: 0.0.40
codegen_flags: <defaults>
</compile_context>

<pallas_src>
import jax
import jax.numpy as jnp
from jax.experimental import pallas as pl
from jax.experimental.pallas import tpu as pltpu

# ---------------- model configuration (mirrors CNN.__init__ args) ----------------
N_IN_FEATS = 4
N_FILTERS = (8, 16)
KERNEL_SIZES = (5, 14)
MAX_POOL_LEN = (2, 1)
RECEPTIVE_FIELD = 32

# Rows (samples) per grid step. With bf16 x tiles: 4096x128 bf16 = 1 MiB (x2 for
# double buffering) + a few MiB of f32 intermediates -- far under the 32 MiB
# scoped VMEM limit and v7x's 64 MiB physical VMEM.
N_TILE = 4096


def _round_up(a, m):
    return -(-a // m) * m


def cnn_receptive_field(kernel_sizes, pool_lens):
    rf, jump = 1, 1
    for k, p in zip(kernel_sizes, pool_lens):
        rf += (k - 1) * jump
        rf += (p - 1) * jump
        jump *= p
    return rf


assert cnn_receptive_field(KERNEL_SIZES, MAX_POOL_LEN) == RECEPTIVE_FIELD, \
    "receptive_field mismatch (same assert as CNN.__init__)"


# ---------------- Pallas kernel: whole 2-layer conv stack, one batch tile ----------------
def _cnn_kernel(x_ref, w_eo_ref, b1_ref, w2_ref, b2_ref, out_ref):
    # x_ref   : [Nt, C_in*L_in]   (= [Nt, 128], lane-dense, bf16 by default)
    # w_eo_ref: [C_in*L_in, 2*H]  fused Toeplitz conv1 weights (H=128): lanes [0,H)=even
    #                             conv output positions, [H,2H)=odd; padded cols are zero.
    # b1_ref  : [1, H]            conv1 bias per (filter, pooled position), zero in padding.
    # w2_ref  : [H, C2]           conv2 weights, contraction flattened (c1, lp), zero-padded rows.
    # b2_ref  : [1, C2]
    # out_ref : [Nt, C2]
    half = b1_ref.shape[-1]
    x = x_ref[...]

    # Layer 1: one 256-wide MXU matmul (f32 accumulation) covering even+odd positions.
    z = jnp.dot(x, w_eo_ref[...], preferred_element_type=jnp.float32)     # [Nt, 2H]

    # maxpool(2) == elementwise max of even/odd positions (lane-aligned static split,
    # no relayout); bias folded out of the max; then ReLU. Pure VPU work.
    hp = jnp.maximum(jnp.maximum(z[:, :half], z[:, half:]) + b1_ref[...], 0.0)

    # Layer 2: conv2 spans the full pooled length == one matmul; bias + ReLU.
    y = jnp.dot(hp.astype(w2_ref.dtype), w2_ref[...],
                preferred_element_type=jnp.float32) + b2_ref[...]
    out_ref[...] = jnp.maximum(y, 0.0)   # pool(1) and dropout(p=0) are identity


# ---------------- weight preprocessing (tiny, done once in the wrapper) ----------------
def _toeplitz_conv1_weights(w1, L_in, Lp, pool, offset, dtype):
    """W[(ci*L_in + li), (c1*Lp + p)] = w1[c1, ci, li - (pool*p + offset)], 0 outside tap range.

    x_flat @ W gives conv1 outputs at positions l = pool*p + offset for all (c1, p).
    """
    C1, C_in, K1 = w1.shape
    li = jnp.arange(L_in)
    p = jnp.arange(Lp)
    dk = li[:, None] - (pool * p[None, :] + offset)            # [L_in, Lp]
    valid = (dk >= 0) & (dk < K1)
    w_g = w1[:, :, jnp.clip(dk, 0, K1 - 1)]                    # [C1, C_in, L_in, Lp]
    w_g = jnp.where(valid[None, None], w_g, 0.0)
    return jnp.transpose(w_g, (1, 2, 0, 3)).reshape(C_in * L_in, C1 * Lp).astype(dtype)


# ---------------- wrapper ----------------
def cnn_forward(x, params, *, compute_dtype=jnp.bfloat16, n_tile=N_TILE):
    """x: [T, batch, N_in_feats, 32] (PyTorch layout). Returns [T, batch, N_out_feats, 1] f32."""
    w1, b1, w2, b2 = params                    # torch layouts: w1 [C1,C_in,K1], w2 [C2,C1,K2]
    T, B, C_in, L_in = x.shape
    assert C_in == N_IN_FEATS
    assert L_in == RECEPTIVE_FIELD
    assert MAX_POOL_LEN == (2, 1)
    C1, C2 = w1.shape[0], w2.shape[0]
    K1, K2 = w1.shape[2], w2.shape[2]
    L1 = L_in - K1 + 1                         # conv1 length (VALID, stride 1)
    assert L1 % MAX_POOL_LEN[0] == 0
    Lp = L1 // MAX_POOL_LEN[0]                 # after maxpool(2)
    assert Lp - K2 + 1 == 1, "final L_out must be 1 (as asserted in CNN.forward)"

    N = T * B
    w_dtype = compute_dtype if compute_dtype is not None else x.dtype

    # Natural flat view (contiguous): no transpose, no extra HBM pass. Ideally the
    # upstream producer already emits bf16 so this cast fuses away.
    x_flat = x.reshape(N, C_in * L_in)
    if x_flat.dtype != w_dtype:
        x_flat = x_flat.astype(w_dtype)

    # Tile the batch axis; pad to whole sublane-aligned tiles; keep >=4 grid steps
    # when there is enough work (megacore sharding on v7x + pipeline overlap).
    n_sub = _round_up(N, 8)
    tile = min(n_tile, max(8, n_sub))
    if n_sub >= 4 * 1024:
        tile = min(tile, _round_up(pl.cdiv(n_sub, 4), 8))
    n_pad = -N % tile
    if n_pad:
        x_flat = jnp.pad(x_flat, ((0, n_pad), (0, 0)))
    n_rows = N + n_pad
    grid = (n_rows // tile,)

    # Fold conv1 + stride-2 maxpool into two Toeplitz matrices, then fuse them into
    # ONE 2*half-wide weight (each half zero-padded from C1*Lp=112 to 128 lanes) so
    # layer-1 is a single full-width MXU matmul and the split is a static lane-128 slice.
    w_even = _toeplitz_conv1_weights(w1, L_in, Lp, MAX_POOL_LEN[0], 0, w_dtype)   # [128, C1*Lp]
    w_odd = _toeplitz_conv1_weights(w1, L_in, Lp, MAX_POOL_LEN[0], 1, w_dtype)
    half = _round_up(C1 * Lp, 128)
    pad_cols = half - C1 * Lp
    w_eo = jnp.concatenate(
        [jnp.pad(w_even, ((0, 0), (0, pad_cols))),
         jnp.pad(w_odd, ((0, 0), (0, pad_cols)))], axis=1)                        # [128, 2*half]

    b1_cols = jnp.repeat(b1.astype(jnp.float32), Lp).reshape(1, C1 * Lp)
    b1_cols = jnp.pad(b1_cols, ((0, 0), (0, pad_cols)))                           # [1, half]

    w2_flat = w2.reshape(C2, C1 * K2).T.astype(w_dtype)                           # [(c1,lp), C2]
    w2_flat = jnp.pad(w2_flat, ((0, pad_cols), (0, 0)))                           # [half, C2]
    b2_row = b2.astype(jnp.float32).reshape(1, C2)

    out = pl.pallas_call(
        _cnn_kernel,
        out_shape=jax.ShapeDtypeStruct((n_rows, C2), jnp.float32),
        grid_spec=pltpu.PrefetchScalarGridSpec(
            num_scalar_prefetch=0,
            grid=grid,
            in_specs=[
                pl.BlockSpec((tile, C_in * L_in), lambda i: (i, 0)),   # streaming x tile
                pl.BlockSpec(w_eo.shape, lambda i: (0, 0)),            # resident fused conv1 W
                pl.BlockSpec(b1_cols.shape, lambda i: (0, 0)),
                pl.BlockSpec(w2_flat.shape, lambda i: (0, 0)),
                pl.BlockSpec(b2_row.shape, lambda i: (0, 0)),
            ],
            out_specs=pl.BlockSpec((tile, C2), lambda i: (i, 0)),
        ),
        compiler_params=pltpu.CompilerParams(
            # Batch tiles are independent -> shard across TCs on v7x. If profiling
            # shows only one TC busy, switch to pltpu.CORE_PARALLEL.
            dimension_semantics=("parallel",),
            vmem_limit_bytes=32 * 1024 * 1024,
        ),
    )(x_flat, w_eo, b1_cols, w2_flat, b2_row)

    return out[:N].reshape(T, B, C2, 1)


# ---------------- independent pure-JAX reference (PyTorch NCW semantics, f32) ----------------
def ref_forward(x, params):
    w1, b1, w2, b2 = params
    T, B, C_in, L = x.shape
    xf = x.reshape(T * B, C_in, L)
    dn = ("NCH", "OIH", "NCH")
    y = jax.lax.conv_general_dilated(xf, w1, (1,), "VALID", dimension_numbers=dn)
    y = jax.nn.relu(y + b1[None, :, None])
    y = jax.lax.reduce_window(y, -jnp.inf, jax.lax.max, (1, 1, 2), (1, 1, 2), "VALID")
    y = jax.lax.conv_general_dilated(y, w2, (1,), "VALID", dimension_numbers=dn)
    y = jax.nn.relu(y + b2[None, :, None])
    return y.reshape(T, B, -1, 1)


if __name__ == "__main__":
    key = jax.random.PRNGKey(0)
    k_x, k_w1, k_b1, k_w2, k_b2 = jax.random.split(key, 5)

    T, B = 2, 2
    C1, C2 = N_FILTERS
    x = jax.random.normal(k_x, (T, B, N_IN_FEATS, RECEPTIVE_FIELD), dtype=jnp.float32)

    # deterministic synthetic parameters (shapes follow nn.Conv1d(in, out, k))
    w1 = 0.1 * jax.random.normal(k_w1, (C1, N_IN_FEATS, KERNEL_SIZES[0]), dtype=jnp.float32)
    b1 = 0.1 * jax.random.normal(k_b1, (C1,), dtype=jnp.float32)
    w2 = 0.1 * jax.random.normal(k_w2, (C2, C1, KERNEL_SIZES[1]), dtype=jnp.float32)
    b2 = 0.1 * jax.random.normal(k_b2, (C2,), dtype=jnp.float32)
    params = (w1, b1, w2, b2)

    ref = jax.block_until_ready(ref_forward(x, params))

    # Default (bf16 operands, f32 accumulation) -- loosened tolerance vs. f32 reference.
    out_bf16 = jax.block_until_ready(cnn_forward(x, params))
    assert out_bf16.shape == (T, B, C2, 1), out_bf16.shape
    assert jnp.allclose(out_bf16, ref, rtol=5e-2, atol=5e-2), \
        float(jnp.max(jnp.abs(out_bf16 - ref)))

    # f32 escape hatch -- tight tolerance sanity check of the fused-weight construction.
    out_f32 = jax.block_until_ready(cnn_forward(x, params, compute_dtype=jnp.float32))
    assert jnp.allclose(out_f32, ref, rtol=1e-3, atol=1e-3), \
        float(jnp.max(jnp.abs(out_f32 - ref)))

    print("KERNEL_OK")
</pallas_src>

<mosaic_0001>
module attributes {stable_mosaic.version = 11 : i64} {
  func.func @_cnn_kernel(%arg0: i32, %arg1: memref<8x128xbf16, #tpu.memory_space<vmem>>, %arg2: memref<128x256xbf16, #tpu.memory_space<vmem>>, %arg3: memref<1x128xf32, #tpu.memory_space<vmem>>, %arg4: memref<128x16xbf16, #tpu.memory_space<vmem>>, %arg5: memref<1x16xf32, #tpu.memory_space<vmem>>, %arg6: memref<8x16xf32, #tpu.memory_space<vmem>>) attributes {dimension_semantics = [#tpu.dimension_semantics<parallel>], iteration_bounds = array<i64: 1>, scalar_prefetch = 0 : i64, scratch_operands = 0 : i64, tpu.core_type = #tpu.core_type<tc>, window_params = [{transform_indices = @transform_0, window_bounds = array<i64: 8, 128>}, {pipeline_mode = #tpu.pipeline_mode<synchronous>, transform_indices = @transform_1, window_bounds = array<i64: 128, 256>}, {pipeline_mode = #tpu.pipeline_mode<synchronous>, transform_indices = @transform_2, window_bounds = array<i64: 1, 128>}, {pipeline_mode = #tpu.pipeline_mode<synchronous>, transform_indices = @transform_3, window_bounds = array<i64: 128, 16>}, {pipeline_mode = #tpu.pipeline_mode<synchronous>, transform_indices = @transform_4, window_bounds = array<i64: 1, 16>}, {transform_indices = @transform_5, window_bounds = array<i64: 8, 16>}]} {
    %c0 = arith.constant 0 : index
    %c0_0 = arith.constant 0 : index
    %0 = vector.load %arg1[%c0, %c0_0] : memref<8x128xbf16, #tpu.memory_space<vmem>>, vector<8x128xbf16>
    %c0_1 = arith.constant 0 : index
    %c0_2 = arith.constant 0 : index
    %1 = vector.load %arg2[%c0_1, %c0_2] : memref<128x256xbf16, #tpu.memory_space<vmem>>, vector<128x256xbf16>
    %cst = arith.constant dense<0.000000e+00> : vector<8x256xf32>
    %2 = tpu.matmul %0, %1, %cst {dimension_numbers = #tpu.dot_dimension_numbers<[1], [0], [0], [1], [0, 0, 1, 1], [], []>} : vector<8x128xbf16>, vector<128x256xbf16>, vector<8x256xf32> -> vector<8x256xf32>
    %3 = vector.extract_strided_slice %2 {offsets = [0, 0], sizes = [8, 128], strides = [1, 1]} : vector<8x256xf32> to vector<8x128xf32>
    %4 = vector.extract_strided_slice %2 {offsets = [0, 128], sizes = [8, 128], strides = [1, 1]} : vector<8x256xf32> to vector<8x128xf32>
    %5 = arith.maximumf %3, %4 : vector<8x128xf32>
    %c0_3 = arith.constant 0 : index
    %c0_4 = arith.constant 0 : index
    %6 = vector.load %arg3[%c0_3, %c0_4] : memref<1x128xf32, #tpu.memory_space<vmem>>, vector<1x128xf32>
    %7 = vector.broadcast %6 : vector<1x128xf32> to vector<8x128xf32>
    %8 = arith.addf %5, %7 : vector<8x128xf32>
    %cst_5 = arith.constant 0.000000e+00 : f32
    %9 = vector.broadcast %cst_5 : f32 to vector<8x128xf32>
    %10 = arith.maximumf %8, %9 : vector<8x128xf32>
    %11 = arith.truncf %10 : vector<8x128xf32> to vector<8x128xbf16>
    %c0_6 = arith.constant 0 : index
    %c0_7 = arith.constant 0 : index
    %12 = vector.load %arg4[%c0_6, %c0_7] : memref<128x16xbf16, #tpu.memory_space<vmem>>, vector<128x16xbf16>
    %cst_8 = arith.constant dense<0.000000e+00> : vector<8x16xf32>
    %13 = tpu.matmul %11, %12, %cst_8 {dimension_numbers = #tpu.dot_dimension_numbers<[1], [0], [0], [1], [0, 0, 1, 1], [], []>} : vector<8x128xbf16>, vector<128x16xbf16>, vector<8x16xf32> -> vector<8x16xf32>
    %c0_9 = arith.constant 0 : index
    %c0_10 = arith.constant 0 : index
    %14 = vector.load %arg5[%c0_9, %c0_10] : memref<1x16xf32, #tpu.memory_space<vmem>>, vector<1x16xf32>
    %15 = vector.broadcast %14 : vector<1x16xf32> to vector<8x16xf32>
    %16 = arith.addf %13, %15 : vector<8x16xf32>
    %cst_11 = arith.constant 0.000000e+00 : f32
    %17 = vector.broadcast %cst_11 : f32 to vector<8x16xf32>
    %18 = arith.maximumf %16, %17 : vector<8x16xf32>
    %c0_12 = arith.constant 0 : index
    %c0_13 = arith.constant 0 : index
    %19 = vector.load %arg6[%c0_12, %c0_13] : memref<8x16xf32, #tpu.memory_space<vmem>>, vector<8x16xf32>
    tpu.vector_store %arg6[%c0_12, %c0_13], %18 {strides = array<i32>} : memref<8x16xf32, #tpu.memory_space<vmem>>, vector<8x16xf32>,
    return
  }
  func.func @transform_0(%arg0: i32) -> (i32, i32) {
    %c0_i32 = arith.constant 0 : i32
    %c0_i32_0 = arith.constant 0 : i32
    return %arg0, %c0_i32 : i32, i32
  }
  func.func @transform_1(%arg0: i32) -> (i32, i32) {
    %c0_i32 = arith.constant 0 : i32
    %c0_i32_0 = arith.constant 0 : i32
    %c0_i32_1 = arith.constant 0 : i32
    return %c0_i32, %c0_i32_0 : i32, i32
  }
  func.func @transform_2(%arg0: i32) -> (i32, i32) {
    %c0_i32 = arith.constant 0 : i32
    %c0_i32_0 = arith.constant 0 : i32
    %c0_i32_1 = arith.constant 0 : i32
    return %c0_i32, %c0_i32_0 : i32, i32
  }
  func.func @transform_3(%arg0: i32) -> (i32, i32) {
    %c0_i32 = arith.constant 0 : i32
    %c0_i32_0 = arith.constant 0 : i32
    %c0_i32_1 = arith.constant 0 : i32
    return %c0_i32, %c0_i32_0 : i32, i32
  }
  func.func @transform_4(%arg0: i32) -> (i32, i32) {
    %c0_i32 = arith.constant 0 : i32
    %c0_i32_0 = arith.constant 0 : i32
    %c0_i32_1 = arith.constant 0 : i32
    return %c0_i32, %c0_i32_0 : i32, i32
  }
  func.func @transform_5(%arg0: i32) -> (i32, i32) {
    %c0_i32 = arith.constant 0 : i32
    %c0_i32_0 = arith.constant 0 : i32
    return %arg0, %c0_i32 : i32, i32
  }
}

</mosaic_0001>

<bundles_post_ra>
// kernel: tpu_custom_call.1
= control target key start
LH: loop header
LB: loop body
LE: loop exit
PB: predicated region body
PF: predicated region fallthrough
CT: control target
= control target key end

     0   :  { %10 = vsyncpa [#allocation3], 0  ;;  %s550_s0 = inlined_call_operand.vmem [shape: bf16[8,128], index: 0, kind: input, shape index: {}]   ;;  %s551_s1 = inlined_call_operand.hbm [shape: bf16[128,256], index: 1, kind: input, shape index: {}]   ;;  %s552_s2 = inlined_call_operand.vmem [shape: f32[1,128], index: 2, kind: input, shape index: {}]   ;;  %s553_s3 = inlined_call_operand.vmem [shape: bf16[128,16], index: 3, kind: input, shape index: {}]   ;;  %s554_s4 = inlined_call_operand.vmem [shape: f32[1,16], index: 4, kind: input, shape index: {}]   ;;  %s555_s5 = inlined_call_operand.hbm [shape: f32[8,16], index: 5, kind: output, shape index: {}]  }
   0x1   :  { %11 = vsyncpa [#allocation4], 0  ;;  %s456_s18 = smov [#allocation2]   ;;  %s408_s22 = scalar_lea.hbm %s551_s1, 2048 }
   0x2   :  { %s19_s19 = sshll.u32 %s456_s18, 4  ;;  %p409_p0 = scmp.ne.s32.totalorder %s551_s1, %s408_s22  ;;  %s20_s19 = int_to_ptr.vmem [resolvable:$true] %s19_s19 }
   0x3   :  { %p412_p1 = scmp.lt.u32.totalorder %s408_s22, %s551_s1 }
   0x5   :  { %p414_p2 = pnand %p412_p1, %p409_p0 }
   0x7   :  { %417 = shalt.err (!%p414_p2)
}
   0x8   :  { %s418_s27 = scalar_lea.vmem %s20_s19, 2048  ;;  %p423_p4 = scmp.lt.s32.totalorder %s20_s19, %s20_s19 }
   0x9   :  { %p419_p3 = scmp.ne.s32.totalorder %s20_s19, %s418_s27  ;;  %p424_p5 = scmp.lt.s32.totalorder %s418_s27, %s418_s27 }
   0xb   :  { %p425_p6 = por %p424_p5, %p423_p4 }
   0xd   :  { %p426_p7 = pnand %p425_p6, %p419_p3 }
   0xf   :  { %429 = shalt.err (!%p426_p7)
}
  0x10   :  { %s457_s28 = smov 128   ;;  %s458_s29 = smov 8  }
  0x11   :  { %25 = dma.hbm_to_vmem [thread:$0]  %s551_s1, 2048, %s20_s19, [#allocation3], %s457_s28, %s457_s28, %s458_s29  }
  0x12   :  { %452 = dma.done.wait [#allocation3], 2048  }
  0x13   :  { %453 = vsyncadd [#allocation3], 4294965248  ;;  %v459_v0 = vmov 0   ;;  %v460_v1 = vmov 0.0   ;;  %v376_v2 = vld [vmem:[#allocation2 + $0x4] ss:$8 sps:$4 sm:$0xff]  }
  0x14   :  { %165 = vmatprep.mubr.bf16.mxu0 %v459_v0  ;;  %349 = vmatprep.subr.bf16.mxu1 %v460_v1  ;;  %v378_v3 = vld [vmem:[#allocation2] ss:$8 sps:$4 sm:$0xff]   ;;  %v379_v4 = vld [vmem:[#allocation2 + $0x14] ss:$8 sps:$4 sm:$0xff]   ;;  %v381_v5 = vld [vmem:[#allocation2 + $0x10] ss:$8 sps:$4 sm:$0xff]  }
  0x15   :  { %133 = vmatprep.subr.bf16.mxu0 %v376_v2  ;;  %v382_v6 = vld [vmem:[#allocation2 + $0x24] ss:$8 sps:$4 sm:$0xff]   ;;  %v384_v7 = vld [vmem:[#allocation2 + $0x20] ss:$8 sps:$4 sm:$0xff]   ;;  %v385_v8 = vld [vmem:[#allocation2 + $0x34] ss:$8 sps:$4 sm:$0xff]  }
  0x16   :  { %134 = vmatpush1.bf16.msra.mxu0 %v378_v3  ;;  %v387_v9 = vld [vmem:[#allocation2 + $0x30] ss:$8 sps:$4 sm:$0xff]   ;;  %v400_v10 = vld [vmem:[%s553_s3] sm:$0xff]   ;;  %v401_v12 = vld [vmem:[%s553_s3 + $0x8] sm:$0xff]   ;;  %vm461_vm0 = vmmov 0   ;;  %vm297_vm1 = vcmask 130048  }
  0x17   :  { %135 = vmatprep.subr.bf16.mxu0 %v379_v4  ;;  %v388_v11 = vld [vmem:[#allocation2 + $0x44] ss:$8 sps:$4 sm:$0xff]   ;;  %350 = vmatpush3.bf16.msra.mxu1 %v400_v10  ;;  %v390_v13 = vld [vmem:[#allocation2 + $0x40] ss:$8 sps:$4 sm:$0xff]   ;;  %v391_v14 = vld [vmem:[#allocation2 + $0x54] ss:$8 sps:$4 sm:$0xff]  }
  0x18   :  { %351 = vmatprep.subr.bf16.mxu1 %v460_v1  ;;  %v402_v15 = vld [vmem:[%s553_s3 + $0x10] sm:$0xff]   ;;  %v394_v17 = vld [vmem:[#allocation2 + $0x64] ss:$8 sps:$4 sm:$0xff]   ;;  %v403_v18 = vld [vmem:[%s553_s3 + $0x18] sm:$0xff]   ;;  %365 = vmatprep.mubr.msk.bf16.mxu1 %vm461_vm0, %v460_v1 }
  0x19   :  { %v393_v16 = vld [vmem:[#allocation2 + $0x50] ss:$8 sps:$4 sm:$0xff]   ;;  %v396_v19 = vld [vmem:[#allocation2 + $0x60] ss:$8 sps:$4 sm:$0xff]   ;;  %v397_v20 = vld [vmem:[#allocation2 + $0x74] ss:$8 sps:$4 sm:$0xff]  }
  0x1a   :  { %136 = vmatpush1.bf16.msra.mxu0 %v381_v5  ;;  %v404_v21 = vld [vmem:[%s553_s3 + $0x20] sm:$0xff]   ;;  %v399_v22 = vld [vmem:[#allocation2 + $0x70] ss:$8 sps:$4 sm:$0xff]   ;;  %v405_v23 = vld [vmem:[%s553_s3 + $0x28] sm:$0xff]  }
  0x1b   :  { %137 = vmatprep.subr.bf16.mxu0 %v382_v6  ;;  %352 = vmatpush3.bf16.msra.mxu1 %v401_v12  ;;  %v36_v24 = vld [vmem:[%s550_s0] sm:$0xf]  ;;  %v406_v25 = vld [vmem:[%s553_s3 + $0x30] sm:$0xff]   ;;  %v407_v26 = vld [vmem:[%s553_s3 + $0x38] sm:$0xff]   ;;  %s462_s3 = smov [#allocation5]  }
  0x1c   :  { %353 = vmatprep.subr.bf16.mxu1 %v460_v1  ;;  %v330_v29 = vld [vmem:[%s552_s2] ss:$0 sm:$0xff]  ;;  %s305_s27 = sshll.u32 %s462_s3, 4  ;;  %s306_s27 = int_to_ptr.vmem [resolvable:$true] %s305_s27 }
  0x1d   :  { %v331_v36 = vld [vmem:[%s554_s4] ss:$0 sm:$0xff]  ;;  %s430_s2 = scalar_lea.vmem %s306_s27, 128  ;;  %p435_p9 = scmp.lt.s32.totalorder %s306_s27, %s306_s27 }
  0x1e   :  { %138 = vmatpush1.bf16.msra.mxu0 %v384_v7  ;;  %p431_p8 = scmp.ne.s32.totalorder %s306_s27, %s430_s2  ;;  %p436_p10 = scmp.lt.s32.totalorder %s430_s2, %s430_s2 }
  0x1f   :  { %139 = vmatprep.subr.bf16.mxu0 %v385_v8  ;;  %354 = vmatpush3.bf16.msra.mxu1 %v402_v15 }
  0x20   :  { %355 = vmatprep.subr.bf16.mxu1 %v460_v1  ;;  %p437_p11 = por %p436_p10, %p435_p9 }
  0x22   :  { %140 = vmatpush1.bf16.msra.mxu0 %v387_v9  ;;  %p438_p12 = pnand %p437_p11, %p431_p8 }
  0x23   :  { %141 = vmatprep.subr.bf16.mxu0 %v388_v11  ;;  %356 = vmatpush3.bf16.msra.mxu1 %v403_v18 }
  0x24   :  { %357 = vmatprep.subr.bf16.mxu1 %v460_v1 }
  0x26   :  { %142 = vmatpush1.bf16.msra.mxu0 %v390_v13 }
  0x27   :  { %143 = vmatprep.subr.bf16.mxu0 %v391_v14  ;;  %358 = vmatpush3.bf16.msra.mxu1 %v404_v21 }
  0x28   :  { %359 = vmatprep.subr.bf16.mxu1 %v460_v1 }
  0x2a   :  { %144 = vmatpush1.bf16.msra.mxu0 %v393_v16 }
  0x2b   :  { %145 = vmatprep.subr.bf16.mxu0 %v394_v17  ;;  %360 = vmatpush3.bf16.msra.mxu1 %v405_v23 }
  0x2c   :  { %361 = vmatprep.subr.bf16.mxu1 %v460_v1 }
  0x2e   :  { %146 = vmatpush1.bf16.msra.mxu0 %v396_v19 }
  0x2f   :  { %147 = vmatprep.subr.bf16.mxu0 %v397_v20  ;;  %362 = vmatpush3.bf16.msra.mxu1 %v406_v25 }
  0x30   :  { %363 = vmatprep.subr.bf16.mxu1 %v460_v1 }
  0x32   :  { %148 = vmatpush1.bf16.msra.mxu0 %v399_v22 }
  0x33   :  { %364 = vmatpush3.bf16.msra.mxu1 %v407_v26 }
  0x35   :  { %166 = vmatmul.mubr.bf16.vlgmr.msra.gmra.mrb[0].mxu0 %v36_v24 }
 0x108   :  { %v167_v27 = vpop.f32.mrb[0].mxu0 }
 0x109   :  { %v169_v28 = vpop.f32.mrb[1].mxu0 }
 0x10a   :  { %v174_v30 = vmax.f32 %v167_v27, %v169_v28  ;;  %v171_v31 = vpop.f32.mrb[2].mxu0 }
 0x10b   :  { %v172_v32 = vpop.f32.mrb[3].mxu0 }
 0x10c   :  { %v182_v33 = vadd.f32 %v330_v29, %v174_v30 }
 0x10e   :  { %v183_v34 = vmax.f32 %v182_v33, 0.0 }
 0x110   :  { %v184_v35 = vpack.c.bf16 %v183_v34, %v183_v34 }
 0x112   :  { %366 = vmatmul.mubr.bf16.vlgmr.msra.gmra.mrb[0].mxu1 %v184_v35 }
 0x1e5   :  { %v290_v37 = vpop.f32.mrb[0].mxu1 }
 0x1e6   :  { %v291_v38 = vadd.f32 %v331_v36, %v290_v37  ;;  %v367_v39 = vpop.f32.mrb[1].mxu1 }
 0x1e7   :  { %v293_v40 = vpop.f32.mrb[2].mxu1 }
 0x1e8   :  { %v296_v41 = vmax.f32 %v291_v38, 0.0  ;;  %v368_v42 = vpop.f32.mrb[3].mxu1 }
 0x1ea   :  { %298 = vst.msk [vmem:[#allocation5] sm:$0xff] %vm297_vm1, %v296_v41 }
 0x1eb   :  { %441 = shalt.err (!%p438_p12)
}
 0x1ec   :  { %s442_s29 = scalar_lea.hbm %s555_s5, 128 }
 0x1ed   :  { %p443_p13 = scmp.ne.s32.totalorder %s555_s5, %s442_s29  ;;  %p446_p0 = scmp.lt.u32.totalorder %s442_s29, %s555_s5 }
 0x1ef   :  { %p448_p1 = pnand %p446_p0, %p443_p13 }
 0x1f1   :  { %451 = shalt.err (!%p448_p1)
}
 0x1f2   :  { %308 = dma.vmem_to_hbm [thread:$0]  %s306_s27, 128, %s555_s5, [#allocation4]  }
 0x1f3   :  { %454 = dma.done.wait [#allocation4], 128  }
 0x1f4   :  { %455 = vsyncadd [#allocation4], 4294967168 }
 0x1f5   :  { %312 = vsyncpa [#allocation3], 1 }
 0x1f6   :  { %313 = vsyncpa [#allocation4], 1 }

</bundles_post_ra>
